<compile_context>
chip_gen: v5e
topology: v5e:2x2
jax: 0.10.0
libtpu: 0.0.40
codegen_flags: <defaults>
</compile_context>

<pallas_src>
import functools

import jax
import jax.numpy as jnp
from jax import lax
from jax.experimental import pallas as pl
from jax.experimental.pallas import tpu as pltpu


def _round_up(x, m):
    return (x + m - 1) // m * m


def _focal_loss_kernel(*refs, gamma, has_weight, mask_b, mask_n,
                       valid_b, valid_n, block_b, block_n):
    if has_weight:
        logits_ref, labels_ref, weight_ref, out_ref = refs
    else:
        logits_ref, labels_ref, out_ref = refs
        weight_ref = None

    x = logits_ref[...].astype(jnp.float32)
    y = labels_ref[...].astype(jnp.float32)

    # One shared EUP exp feeds both the stable BCE log term and the sigmoid.
    e = jnp.exp(-jnp.abs(x))
    # Numerically-stable BCE-with-logits (same formula PyTorch uses):
    #   ce = max(x, 0) - x*y + log(1 + exp(-|x|))
    ce = jnp.maximum(x, 0.0) - x * y + jnp.log1p(e)

    # sigmoid(x): divide moved onto the (otherwise idle) EUP via approx
    # reciprocal + one Newton step (~f32 exact) -> fewer VALU ops, which is the
    # binding slot on v7x / bf16-on-v6e.
    d = 1.0 + e
    r = pl.reciprocal(d, approx=True)
    r = r * (2.0 - d * r)                      # Newton refinement
    p = jnp.where(x >= 0.0, r, e * r)          # == sigmoid(x)

    # 1 - pt = 1 - (y*p + (1-y)*(1-p)) == p + y - 2*p*y  (fewer VALU ops).
    one_m_pt = p + y - 2.0 * (p * y)

    g = float(gamma)
    if g == 0.0:
        focal = jnp.ones_like(one_m_pt)
    elif g.is_integer() and 0 < g <= 8:
        # gamma=2 (default): plain multiplies, no pow (no extra EUP exp/log).
        focal = one_m_pt
        for _ in range(int(g) - 1):
            focal = focal * one_m_pt
    else:
        # Fractional gamma: clamp base so fp rounding can't produce NaN.
        focal = jnp.power(jnp.maximum(one_m_pt, 0.0), jnp.float32(g))

    loss = focal * ce
    if has_weight:
        # weight block is (block_b, block_n) or (1, block_n); both broadcast.
        loss = loss * weight_ref[...].astype(jnp.float32)

    # Mask the overhang of ragged last blocks.  Emitted only for axes that are
    # actually ragged (static flags).  jnp.where is a true select, so garbage
    # that flowed through exp/log in the overhang is simply discarded.
    if mask_b or mask_n:
        keep = None
        if mask_b:
            row = (pl.program_id(0) * block_b
                   + lax.broadcasted_iota(jnp.int32, (block_b, block_n), 0))
            keep = row < valid_b
        if mask_n:
            col = (pl.program_id(1) * block_n
                   + lax.broadcasted_iota(jnp.int32, (block_b, block_n), 1))
            kn = col < valid_n
            keep = kn if keep is None else (keep & kn)
        loss = jnp.where(keep, loss, 0.0)

    # Per-block partial sum splatted over a lane-dense (8,128) output tile.
    # No per-step scalar RMW -> both grid axes stay "parallel" (v7x megacore).
    # The wrapper picks element [0,0] of each tile and finishes the mean in JAX.
    partial = jnp.sum(loss)
    out_ref[...] = jnp.broadcast_to(partial, (8, 128)).astype(jnp.float32)


def focal_loss(logits, labels, weight=None, *, gamma=2.0,
               block_b=None, block_n=None):
    """Pallas TPU focal loss.  Returns a scalar f32 (mean over all elements).

    `weight` may be per-element (B, N) or per-class (N,)."""
    assert logits.ndim == 2 and logits.shape == labels.shape
    B, N = logits.shape
    has_weight = weight is not None
    per_class_weight = False
    if has_weight:
        if weight.ndim == 1:
            assert weight.shape == (N,)
            weight = weight.reshape(1, N)
            per_class_weight = True
        else:
            assert weight.shape == (B, N)

    # ---- generation-aware tile budget --------------------------------------
    # v5e/v6e: 128 MiB physical VMEM -> ~4 MiB f32 blocks; v7x: 64 MiB -> ~1 MiB
    # blocks (headroom left for double-buffered inputs + block-sized f32 temps).
    try:
        vmem_cap = pltpu.get_tpu_info().vmem_capacity_bytes
    except Exception:
        vmem_cap = 64 * 1024 * 1024
    if vmem_cap >= 100 * 1024 * 1024:
        target_elems = 1024 * 1024          # 4 MiB per f32 input block
        vmem_limit = 100 * 1024 * 1024
    else:
        target_elems = 256 * 1024           # 1 MiB per f32 input block
        vmem_limit = 48 * 1024 * 1024

    # ---- block sizing: prefer contiguous full-width rows --------------------
    n_pad = _round_up(N, 128)
    if block_n is None:
        if n_pad * 8 <= target_elems:
            block_n = N                      # one contiguous full row per block
        else:
            block_n = max(128, (target_elems // 8) // 128 * 128)
    if block_b is None:
        row_budget = max(8, (target_elems // _round_up(block_n, 128)) // 8 * 8)
        block_b = B if B <= row_budget else row_budget

    grid_b = pl.cdiv(B, block_b)
    grid_n = pl.cdiv(N, block_n)

    # Give v7x's two TensorCores something to shard (harmless on 1-TC chips).
    if grid_b * grid_n < 2:
        if B >= 16:
            block_b = _round_up(pl.cdiv(B, 2), 8)
            grid_b = pl.cdiv(B, block_b)
        elif n_pad >= 256:
            block_n = _round_up(pl.cdiv(N, 2), 128)
            grid_n = pl.cdiv(N, block_n)

    mask_b = grid_b * block_b > B
    mask_n = grid_n * block_n > N

    kernel = functools.partial(
        _focal_loss_kernel,
        gamma=float(gamma), has_weight=has_weight,
        mask_b=mask_b, mask_n=mask_n,
        valid_b=B, valid_n=N, block_b=block_b, block_n=block_n)

    in_specs = [pl.BlockSpec((block_b, block_n), lambda bi, ni: (bi, ni)),
                pl.BlockSpec((block_b, block_n), lambda bi, ni: (bi, ni))]
    inputs = [logits, labels]
    if has_weight:
        if per_class_weight:
            in_specs.append(pl.BlockSpec((1, block_n), lambda bi, ni: (0, ni)))
        else:
            in_specs.append(pl.BlockSpec((block_b, block_n),
                                         lambda bi, ni: (bi, ni)))
        inputs.append(weight)

    partials = pl.pallas_call(
        kernel,
        out_shape=jax.ShapeDtypeStruct((grid_b * 8, grid_n * 128), jnp.float32),
        grid_spec=pltpu.PrefetchScalarGridSpec(
            num_scalar_prefetch=0,
            grid=(grid_b, grid_n),
            in_specs=in_specs,
            out_specs=pl.BlockSpec((8, 128), lambda bi, ni: (bi, ni)),
        ),
        compiler_params=pltpu.CompilerParams(
            dimension_semantics=("parallel", "parallel"),
            vmem_limit_bytes=vmem_limit),
    )(*inputs)

    # Element [0,0] of every (8,128) tile holds that block's partial sum.
    total = jnp.sum(partials[::8, ::128])
    # Python-float reciprocal avoids int->f32 precision loss for B*N > 2^24.
    return total * jnp.float32(1.0 / (float(B) * float(N)))


def _focal_loss_ref(logits, labels, weight=None, gamma=2.0):
    x = logits.astype(jnp.float32)
    y = labels.astype(jnp.float32)
    p = jax.nn.sigmoid(x)
    ce = jnp.maximum(x, 0.0) - x * y + jnp.log1p(jnp.exp(-jnp.abs(x)))
    pt = y * p + (1.0 - y) * (1.0 - p)
    loss = (1.0 - pt) ** gamma * ce
    if weight is not None:
        loss = loss * weight.astype(jnp.float32)
    return jnp.mean(loss)


if __name__ == "__main__":
    key = jax.random.PRNGKey(0)
    k_logits, k_labels, k_weight = jax.random.split(key, 3)

    B, N = 8, 512  # batch x num_labels (small synthetic multi-label problem)
    logits = jax.random.normal(k_logits, (B, N), dtype=jnp.float32) * 2.0
    labels = jax.random.bernoulli(k_labels, p=0.3, shape=(B, N)).astype(jnp.float32)
    weight = jax.random.uniform(k_weight, (B, N), dtype=jnp.float32)
    weight_c = jax.random.uniform(k_weight, (N,), dtype=jnp.float32)  # per-class

    # Unweighted path (only 2 arrays read from HBM).
    out = jax.block_until_ready(focal_loss(logits, labels, gamma=2.0))
    ref = _focal_loss_ref(logits, labels, gamma=2.0)
    assert jnp.allclose(out, ref, rtol=3e-5, atol=1e-6), (out, ref)

    # Per-element weight.
    out = jax.block_until_ready(focal_loss(logits, labels, weight, gamma=2.0))
    ref = _focal_loss_ref(logits, labels, weight, gamma=2.0)
    assert jnp.allclose(out, ref, rtol=3e-5, atol=1e-6), (out, ref)

    # Per-class weight (shape (N,)): read once per column block, not B times.
    out = jax.block_until_ready(focal_loss(logits, labels, weight_c, gamma=2.0))
    ref = _focal_loss_ref(logits, labels, weight_c, gamma=2.0)
    assert jnp.allclose(out, ref, rtol=3e-5, atol=1e-6), (out, ref)

    # Fractional gamma exercises the clamped-pow branch.
    out = jax.block_until_ready(focal_loss(logits, labels, gamma=1.5))
    ref = _focal_loss_ref(logits, labels, gamma=1.5)
    assert jnp.allclose(out, ref, rtol=3e-5, atol=1e-6), (out, ref)

    # bf16 inputs (half the HBM traffic); math stays f32 in-kernel.
    lb, yb, wb = (logits.astype(jnp.bfloat16), labels.astype(jnp.bfloat16),
                  weight.astype(jnp.bfloat16))
    out = jax.block_until_ready(focal_loss(lb, yb, wb, gamma=2.0))
    ref = _focal_loss_ref(lb, yb, wb, gamma=2.0)
    assert jnp.allclose(out, ref, rtol=1e-4, atol=1e-5), (out, ref)

    # Ragged N: no wrapper-side jnp.pad; the overhanging block is masked in-kernel.
    B2, N2 = 5, 200
    l2 = jax.random.normal(k_logits, (B2, N2), dtype=jnp.float32)
    y2 = jax.random.bernoulli(k_labels, p=0.3, shape=(B2, N2)).astype(jnp.float32)
    out = jax.block_until_ready(focal_loss(l2, y2, gamma=2.0))
    ref = _focal_loss_ref(l2, y2, gamma=2.0)
    assert jnp.allclose(out, ref, rtol=3e-5, atol=1e-6), (out, ref)

    # Ragged B and N + explicit small blocks: both overhang masks + multi-block grid.
    B3, N3 = 37, 300
    l3 = jax.random.normal(k_logits, (B3, N3), dtype=jnp.float32)
    y3 = jax.random.bernoulli(k_labels, p=0.3, shape=(B3, N3)).astype(jnp.float32)
    w3 = jax.random.uniform(k_weight, (B3, N3), dtype=jnp.float32)
    out = jax.block_until_ready(
        focal_loss(l3, y3, w3, gamma=2.0, block_b=16, block_n=128))
    ref = _focal_loss_ref(l3, y3, w3, gamma=2.0)
    assert jnp.allclose(out, ref, rtol=3e-5, atol=1e-6), (out, ref)

    print("KERNEL_OK")
</pallas_src>

<mosaic_0001>
module attributes {stable_mosaic.version = 11 : i64} {
  func.func @_focal_loss_kernel(%arg0: i32, %arg1: i32, %arg2: memref<8x256xf32, #tpu.memory_space<vmem>>, %arg3: memref<8x256xf32, #tpu.memory_space<vmem>>, %arg4: memref<8x128xf32, #tpu.memory_space<vmem>>) attributes {dimension_semantics = [#tpu.dimension_semantics<parallel>, #tpu.dimension_semantics<parallel>], iteration_bounds = array<i64: 1, 2>, scalar_prefetch = 0 : i64, scratch_operands = 0 : i64, tpu.core_type = #tpu.core_type<tc>, window_params = [{transform_indices = @transform_0, window_bounds = array<i64: 8, 256>}, {transform_indices = @transform_1, window_bounds = array<i64: 8, 256>}, {transform_indices = @transform_2, window_bounds = array<i64: 8, 128>}]} {
    %c0 = arith.constant 0 : index
    %c0_0 = arith.constant 0 : index
    %0 = vector.load %arg2[%c0, %c0_0] : memref<8x256xf32, #tpu.memory_space<vmem>>, vector<8x256xf32>
    %c0_1 = arith.constant 0 : index
    %c0_2 = arith.constant 0 : index
    %1 = vector.load %arg3[%c0_1, %c0_2] : memref<8x256xf32, #tpu.memory_space<vmem>>, vector<8x256xf32>
    %2 = math.absf %0 : vector<8x256xf32>
    %cst = arith.constant 0.000000e+00 : f32
    %3 = vector.broadcast %cst : f32 to vector<8x256xf32>
    %4 = arith.subf %3, %2 : vector<8x256xf32>
    %5 = math.exp %4 : vector<8x256xf32>
    %cst_3 = arith.constant 0.000000e+00 : f32
    %6 = vector.broadcast %cst_3 : f32 to vector<8x256xf32>
    %7 = arith.maximumf %0, %6 : vector<8x256xf32>
    %8 = arith.mulf %0, %1 : vector<8x256xf32>
    %9 = arith.subf %7, %8 : vector<8x256xf32>
    %10 = math.log1p %5 : vector<8x256xf32>
    %11 = arith.addf %9, %10 : vector<8x256xf32>
    %cst_4 = arith.constant 1.000000e+00 : f32
    %12 = vector.broadcast %cst_4 : f32 to vector<8x256xf32>
    %13 = arith.addf %12, %5 : vector<8x256xf32>
    %14 = tpu.reciprocal %13 {approx = true} : vector<8x256xf32> -> vector<8x256xf32>
    %15 = arith.mulf %13, %14 : vector<8x256xf32>
    %cst_5 = arith.constant 2.000000e+00 : f32
    %16 = vector.broadcast %cst_5 : f32 to vector<8x256xf32>
    %17 = arith.subf %16, %15 : vector<8x256xf32>
    %18 = arith.mulf %14, %17 : vector<8x256xf32>
    %cst_6 = arith.constant 0.000000e+00 : f32
    %19 = vector.broadcast %cst_6 : f32 to vector<8x256xf32>
    %20 = arith.cmpf oge, %0, %19 : vector<8x256xf32>
    %21 = arith.mulf %5, %18 : vector<8x256xf32>
    %22 = arith.select %20, %18, %21 : vector<8x256xi1>, vector<8x256xf32>
    %23 = arith.addf %22, %1 : vector<8x256xf32>
    %24 = arith.mulf %22, %1 : vector<8x256xf32>
    %cst_7 = arith.constant 2.000000e+00 : f32
    %25 = vector.broadcast %cst_7 : f32 to vector<8x256xf32>
    %26 = arith.mulf %25, %24 : vector<8x256xf32>
    %27 = arith.subf %23, %26 : vector<8x256xf32>
    %28 = arith.mulf %27, %27 : vector<8x256xf32>
    %29 = arith.mulf %28, %11 : vector<8x256xf32>
    %30 = vector.shape_cast %29 : vector<8x256xf32> to vector<1x8x256xf32>
    %cst_8 = arith.constant dense<0.000000e+00> : vector<1xf32>
    %31 = vector.multi_reduction <add>, %30, %cst_8 [1, 2] : vector<1x8x256xf32> to vector<1xf32>
    %32 = vector.shape_cast %31 : vector<1xf32> to vector<1x1x1xf32>
    %33 = vector.extract %32[0, 0, 0] : f32 from vector<1x1x1xf32>
    %34 = vector.broadcast %33 : f32 to vector<8x128xf32>
    %c0_9 = arith.constant 0 : index
    %c0_10 = arith.constant 0 : index
    %35 = vector.load %arg4[%c0_9, %c0_10] : memref<8x128xf32, #tpu.memory_space<vmem>>, vector<8x128xf32>
    tpu.vector_store %arg4[%c0_9, %c0_10], %34 {strides = array<i32>} : memref<8x128xf32, #tpu.memory_space<vmem>>, vector<8x128xf32>,
    return
  }
  func.func @transform_0(%arg0: i32, %arg1: i32) -> (i32, i32) {
    %c0_i32 = arith.constant 0 : i32
    return %arg0, %arg1 : i32, i32
  }
  func.func @transform_1(%arg0: i32, %arg1: i32) -> (i32, i32) {
    %c0_i32 = arith.constant 0 : i32
    return %arg0, %arg1 : i32, i32
  }
  func.func @transform_2(%arg0: i32, %arg1: i32) -> (i32, i32) {
    %c0_i32 = arith.constant 0 : i32
    return %arg0, %arg1 : i32, i32
  }
}

</mosaic_0001>

<bundles_post_ra>
// kernel: tpu_custom_call.1
= control target key start
LH: loop header
LB: loop body
LE: loop exit
PB: predicated region body
PF: predicated region fallthrough
CT: control target
= control target key end

     0   :  { %7 = vsyncpa [#allocation3], 0  ;;  %s834_s0 = inlined_call_operand.hbm [shape: f32[8,512], index: 0, kind: input, shape index: {}]   ;;  %s835_s1 = inlined_call_operand.hbm [shape: f32[8,512], index: 1, kind: input, shape index: {}]   ;;  %s836_s2 = inlined_call_operand.hbm [shape: f32[8,256], index: 2, kind: output, shape index: {}]  }
   0x1   :  { %9 = vsyncpa [#allocation3 + $0x1], 0 }
   0x2   :  { %10 = vsyncpa [#allocation6], 0 }
   0x3   :  { %12 = vsyncpa [#allocation6 + $0x1], 0 }
   0x4   :  { %13 = vsyncpa [#allocation4], 0 }
   0x5   :  { %15 = vsyncpa [#allocation4 + $0x1], 0  ;;  %s695_s9 = smov 0   ;;  %s697_s10 = smov 0  }
   0x6   :  { %s699_s11 = smov 0   ;;  %s701_s12 = smov 0  }
   0x7   :  { %s703_s13 = smov 0   ;;  %s705_s14 = smov 0  }
   0x8 LB: > { %s431_s15 = sadd.s32 4294967295, %s678_s14   ;;  %s432_s16 = sadd.s32 4294967294, %s678_s14   ;;  %s678_s14 = sphi %s705_s14, %s21_s14   ;;  %s674_s13 = sphi %s703_s13, %s847_s13   ;;  %s670_s12 = sphi %s701_s12, %s846_s12   ;;  %s666_s11 = sphi %s699_s11, %s845_s11   ;;  %s662_s10 = sphi %s697_s10, %s844_s10   ;;  %s658_s9 = sphi %s695_s9, %s843_s9  }
   0x9   : > { %s30_s17 = sadd.s32 1, %s674_s13  ;;  %s42_s18 = sadd.s32 1, %s666_s11 }
   0xa   : > { %p31_p0 = scmp.ge.s32.totalorder %s30_s17, 2  ;;  %p49_p1 = scmp.ne.s32.totalorder %s666_s11, %s662_s10 }
   0xb   : > { %p50_p2 = scmp.eq.s32.totalorder %s678_s14, 0  ;;  %p55_p3 = scmp.ne.s32.totalorder %s662_s10, %s658_s9 }
   0xc   : > { %s849_s17 = smov (%p31_p0, %s30_s17), 0  ;;  %p56_p5 = scmp.eq.s32.totalorder %s431_s15, 0 }
   0xd   : > { %p736_p4 = por %p50_p2, %p49_p1  ;;  %s38_s20 = ssub.s32 %s674_s13, %s849_s17 }
   0xe   : > { %p109_p6 = scmp.eq.s32.totalorder %s431_s15, 1  ;;  %p40_p7 = scmp.eq.s32.totalorder %s38_s20, 0 }
   0xf   : > { %p742_p8 = por %p56_p5, %p55_p3  ;;  %p115_p10 = scmp.eq.s32.totalorder %s432_s16, 1 }
  0x10   : > { %p746_p9 = por %p109_p6, %p49_p1  ;;  %p434_p12 = scmp.ge.s32.totalorder %s678_s14, 2 }
  0x11   : > { %s751_s23 = scalar_select %p40_p7, %s666_s11, %s42_s18  }
  0x12   : > { %p753_p11 = por %p115_p10, %p55_p3  ;;  %p470_p13 = scmp.lt.s32.totalorder %s678_s14, 2 }
  0x13   : > { %s135_s25 = sand.u32 1, %s666_s11   ;;  %s449_s27 = sshll.u32 %s674_s13, 4 }
  0x14   : > { %s435_s26 = sshll.u32 %s135_s25, 4  ;;  %s146_s30 = scalar_lea.hbm %s834_s0, %s449_s27 }
  0x15   : > { %s139_s3 = scalar_lea.vmem [#allocation2], %s435_s26  ;;  %s148_s5 = sshll.u32 %s146_s30, 4  ;;  %s149_s5 = int_to_ptr.hbm [resolvable:$true] %s148_s5 }
  0x16   : > { %s150_s4 = sshll.u32 %s139_s3, 4  ;;  %p460_p0 = pnand %p470_p13, %p736_p4  ;;  %s151_s4 = int_to_ptr.vmem [resolvable:$true] %s150_s4 }
  0x17   : > { %p441_p1 = scmp.ge.s32.totalorder %s678_s14, 1  ;;  %p177_p2 = scmp.lt.s32.totalorder %s678_s14, 3 }
  0x18   : > { %s136_s6 = scalar_lea.sflag [#allocation3], %s135_s25  ;;  %s168_s15 = scalar_lea.hbm %s835_s1, %s449_s27 }
  0x19   : > { %462 = dma.hbm_to_vmem [thread:$0]  (!%p460_p0), %s149_s5, 256, %s151_s4, %s136_s6  }
  0x1a   : > { %p178_p3 = pnand %p441_p1, %p177_p2  ;;  %s161_s16 = scalar_lea.vmem [#allocation5], %s435_s26 }
  0x1b   : > { %s172_s18 = sshll.u32 %s161_s16, 4  ;;  %s170_s20 = sshll.u32 %s168_s15, 4  ;;  %s173_s18 = int_to_ptr.vmem [resolvable:$true] %s172_s18  ;;  %s171_s20 = int_to_ptr.hbm [resolvable:$true] %s170_s20 }
  0x1c   : > { %s158_s28 = scalar_lea.sflag [#allocation6], %s135_s25  ;;  %181 = sbr.rel (%p178_p3) target bundleno = 263 (0x107), region = 28 }
  0x1d   : > { %465 = dma.hbm_to_vmem [thread:$0]  (!%p460_p0), %s171_s20, 256, %s173_s18, %s158_s28  }
  0x1e   : > { %s772_s19 = sand.u32 (!%p178_p3), 1, %s662_s10  }
  0x1f   : > { %s442_s29 = sshll.u32 (!%p178_p3), %s772_s19, 4  ;;  %s184_s30 = scalar_lea.sflag (!%p178_p3), [#allocation3], %s772_s19 }
  0x20   : > { %s187_s3 = scalar_lea.vmem (!%p178_p3), [#allocation2], %s442_s29 }
  0x21   : > { %645 = dma.done.wait (%p742_p8), %s184_s30, 256  }
  0x22   : > { %647 = vsyncadd (%p742_p8), %s184_s30, 4294967040  ;;  %s194_s26 = scalar_lea.sflag [#allocation6], %s772_s19  ;;  %s781_s25 = scalar_lea.vmem [#allocation5], %s442_s29 }
  0x23   : > { %649 = dma.done.wait (%p742_p8), %s194_s26, 256  }
  0x24   : > { %651 = vsyncadd (%p742_p8), %s194_s26, 4294967040  ;;  %v226_v0 = vld [vmem:[%s187_s3] sm:$0xff]  ;;  %v227_v1 = vld [vmem:[%s187_s3 + $0x8] sm:$0xff]  ;;  %s444_s21 = sshll.u32 %s772_s19, 3  ;;  %s446_s27 = sshll.u32 %s670_s12, 3 }
  0x25   : > { %v230_v2 = vand.u32 2147483647, %v226_v0  ;;  %v231_v3 = vand.u32 2147483647, %v227_v1  ;;  %v228_v21 = vld [vmem:[%s781_s25] sm:$0xff]  ;;  %v229_v26 = vld [vmem:[%s781_s25 + $0x8] sm:$0xff]  ;;  %s317_s6 = scalar_lea.hbm %s836_s2, %s446_s27 }
  0x26   : > { %v238_v27 = vmax.f32 %v226_v0, 0.0  ;;  %v240_v28 = vmul.f32 %v228_v21, %v226_v0  ;;  %v239_v31 = vmax.f32 %v227_v1, 0.0  ;;  %v241_v32 = vmul.f32 %v229_v26, %v227_v1  ;;  %s223_s7 = scalar_lea.vmem [#allocation7], %s444_s21  ;;  %s321_s15 = sshll.u32 %s317_s6, 4  ;;  %s322_s15 = int_to_ptr.hbm [resolvable:$true] %s321_s15 }
  0x27   : > { %v232_v4 = vsub.f32 0.0, %v230_v2  ;;  %v233_v5 = vsub.f32 0.0, %v231_v3  ;;  %vm274_vm0 = vcmp.ge.f32.partialorder %v226_v0, 0.0  ;;  %vm275_vm1 = vcmp.ge.f32.partialorder %v227_v1, 0.0  ;;  %s319_s8 = sshll.u32 %s223_s7, 4  ;;  %s305_s18 = scalar_lea.sflag [#allocation4], %s772_s19  ;;  %s320_s8 = int_to_ptr.vmem [resolvable:$true] %s319_s8 }
  0x28   : > { %v242_v42 = vsub.f32 %v238_v27, %v240_v28  ;;  %v243_v46 = vsub.f32 %v239_v31, %v241_v32  ;;  %s606_s20 = sshra.s32 %s322_s15, 4  ;;  %s612_s30 = scalar_lea.hbm %s836_s2, 16  ;;  %s607_s20 = int_to_ptr.hbm [resolvable:$true] %s606_s20 }
  0x29   : > { %v234_v6 = vmul.f32 1.442695, %v232_v4  ;;  %v236_v7 = vmul.f32 1.442695, %v233_v5  ;;  %s608_s28 = scalar_lea.hbm %s607_s20, 8  ;;  %p613_p7 = scmp.lt.s32.totalorder %s607_s20, %s836_s2 }
  0x2a   : > { %p609_p4 = scmp.ne.s32.totalorder %s607_s20, %s608_s28  ;;  %p614_p8 = scmp.lt.s32.totalorder %s612_s30, %s608_s28 }
  0x2b   : > { %520 = vpow2.f32 %v234_v6 }
  0x2c   : > { %522 = vpow2.f32 %v236_v7  ;;  %p610_p5 = pnand %p609_p4, %p746_p9  ;;  %p615_p10 = por %p614_p8, %p613_p7 }
  0x2e   : > { %p611_p6 = pneg %p610_p5 }
  0x30   : > { %p616_p13 = pnand %p615_p10, %p611_p6 }
  0x31   : > { %v521_v8 = vpop.eup %520 }
  0x32   : > { %v523_v9 = vpop.eup %522  ;;  %v244_v10 = vadd.f32 1.0, %v521_v8  ;;  %v247_v12 = vmul.f32 -0.5, %v521_v8  ;;  %v250_v22 = vand.u32 2147483647, %v521_v8 }
  0x33   : > { %v253_v11 = vadd.f32 1.0, %v523_v9  ;;  %v256_v14 = vmul.f32 -0.5, %v523_v9  ;;  %v259_v29 = vand.u32 2147483647, %v523_v9 }
  0x34   : > { %524 = vrcp.f32 %v244_v10  ;;  %v248_v18 = vadd.f32 1.0, %v247_v12  ;;  %vm789_vm2 = vcmp.lt.f32.partialorder %v250_v22, 0.0004427343 }
  0x35   : > { %526 = vrcp.f32 %v253_v11  ;;  %v257_v23 = vadd.f32 1.0, %v256_v14  ;;  %vm260_vm3 = vcmp.lt.f32.partialorder %v259_v29, 0.0004427343 }
  0x36   : > { %528 = vlog2.f32 %v244_v10  ;;  %v249_v35 = vmul.f32 %v521_v8, %v248_v18 }
  0x37   : > { %530 = vlog2.f32 %v253_v11  ;;  %v258_v39 = vmul.f32 %v523_v9, %v257_v23 }
  0x3a   : > { %v525_v13 = vpop.eup %524 }
  0x3b   : > { %v527_v15 = vpop.eup %526  ;;  %v268_v16 = vmul.f32 %v525_v13, %v244_v10 }
  0x3c   : > { %v269_v17 = vmul.f32 %v527_v15, %v253_v11  ;;  %v529_v20 = vpop.eup %528 }
  0x3d   : > { %v270_v19 = vsub.f32 2.0, %v268_v16  ;;  %v531_v25 = vpop.eup %530  ;;  %v246_v34 = vmul.f32 0.6931472, %v529_v20 }
  0x3e   : > { %v271_v24 = vsub.f32 2.0, %v269_v17  ;;  %v255_v38 = vmul.f32 0.6931472, %v531_v25 }
  0x3f   : > { %v272_v30 = vmul.f32 %v525_v13, %v270_v19  ;;  %v252_v47 = vsel %vm789_vm2, %v249_v35, %v246_v34 }
  0x40   : > { %v273_v33 = vmul.f32 %v527_v15, %v271_v24  ;;  %v261_v50 = vsel %vm260_vm3, %v258_v39, %v255_v38  ;;  %v262_v53 = vadd.f32 %v252_v47, %v242_v42 }
  0x41   : > { %v276_v36 = vmul.f32 %v521_v8, %v272_v30  ;;  %v263_v55 = vadd.f32 %v261_v50, %v243_v46 }
  0x42   : > { %v277_v40 = vmul.f32 %v523_v9, %v273_v33 }
  0x43   : > { %v278_v41 = vsel %vm274_vm0, %v272_v30, %v276_v36 }
  0x44   : > { %v279_v43 = vsel %vm275_vm1, %v273_v33, %v277_v40  ;;  %v280_v44 = vadd.f32 %v278_v41, %v228_v21  ;;  %v282_v45 = vmul.f32 %v278_v41, %v228_v21 }
  0x45   : > { %v281_v48 = vadd.f32 %v279_v43, %v229_v26  ;;  %v283_v49 = vmul.f32 %v279_v43, %v229_v26 }
  0x46   : > { %v284_v51 = vmul.f32 2.0, %v282_v45 }
  0x47   : > { %v285_v52 = vmul.f32 2.0, %v283_v49 }
  0x48   : > { %v286_v54 = vsub.f32 %v280_v44, %v284_v51 }
  0x49   : > { %v287_v56 = vsub.f32 %v281_v48, %v285_v52 }
  0x4a   : > { %v288_v57 = vmul.f32 %v286_v54, %v286_v54 }
  0x4b   : > { %v289_v58 = vmul.f32 %v287_v56, %v287_v56 }
  0x4c   : > { %v290_v59 = vmul.f32 %v288_v57, %v262_v53 }
  0x4d   : > { %v291_v60 = vmul.f32 %v289_v58, %v263_v55 }
  0x4f   : > { %v292_v61 = vadd.f32 %v291_v60, %v290_v59 }
  0x51   : > { %293 = vadd.xlane.f32.xlu0 %v292_v61 }
  0xc4   : > { %v294_v62 = vpop.xlane.xlu0 %293 }
  0xc5   : > { %v295_v63 = vrot.slane %v294_v62, 4 }
  0xc7   : > { %v296_v0 = vadd.f32 %v295_v63, %v294_v62 }
  0xc9   : > { %v297_v1 = vrot.slane %v296_v0, 2 }
  0xcb   : > { %v298_v2 = vadd.f32 %v297_v1, %v296_v0 }
  0xcd   : > { %v299_v3 = vrot.slane %v298_v2, 1 }
  0xcf   : > { %v300_v4 = vadd.f32 %v299_v3, %v298_v2 }
  0xd1   : > { %451 = vpush %v300_v4 }
 0x102   : > { %s452_s16 = spop %451 }
 0x103   : > { %v302_v5 = vstv %s452_s16 }
 0x104   : > { %303 = vst [vmem:[%s223_s7] sm:$0xff] %v302_v5 }
 0x105   : > { %619 = shalt.err (!%p616_p13)
}
 0x106   : > { %457 = dma.vmem_to_hbm [thread:$0]  (%p746_p9), %s320_s8, 128, %s322_s15, %s305_s18  }
 0x107 PF: > { %s333_s19 = sand.u32 1, %s658_s9   ;;  %p467_p0 = pnand %p434_p12, %p753_p11 }
 0x108   : > { %s334_s25 = scalar_lea.sflag [#allocation4], %s333_s19 }
 0x109   : > { %p468_p1 = pneg %p467_p0 }
 0x10b   : > { %653 = dma.done.wait (%p468_p1), %s334_s25, 128  }
 0x10c   : > { %655 = vsyncadd (%p468_p1), %s334_s25, 4294967168  ;;  %s21_s14 = sadd.s32 1, %s678_s14   ;;  %s843_s9 = smov %s662_s10 }
 0x10d   : > { %p18_p2 = scmp.ge.s32.totalorder %s21_s14, 4   ;;  %s844_s10 = smov %s666_s11 }
 0x10e   : > { %s845_s11 = smov %s751_s23  ;;  %s846_s12 = smov %s674_s13 }
 0x10f   : > { %s847_s13 = smov %s849_s17  ;;  %20 = sbr.rel (!%p18_p2) target bundleno = 8 (0x8), region = 86 }
 0x114   :  { %340 = vsyncpa [#allocation3], 1 }
 0x115   :  { %342 = vsyncpa [#allocation3 + $0x1], 1 }
 0x116   :  { %343 = vsyncpa [#allocation6], 1 }
 0x117   :  { %345 = vsyncpa [#allocation6 + $0x1], 1 }
 0x118   :  { %346 = vsyncpa [#allocation4], 1 }
 0x119   :  { %348 = vsyncpa [#allocation4 + $0x1], 1 }

</bundles_post_ra>
